<compile_context>
chip_gen: v5e
topology: v5e:2x2
jax: 0.10.0
libtpu: 0.0.40
codegen_flags: <defaults>
</compile_context>

<pallas_src>
import functools

import jax
import jax.numpy as jnp
from jax.experimental import pallas as pl
from jax.experimental.pallas import tpu as pltpu  # noqa: F401 (kept for clarity)


def _cond_curve_kernel(T, scale_factor, k,
                       xcat_ref, x0_ref, x1_ref, t_ref,
                       wf1_ref, bf1_ref, wf2_ref, bf2_ref,
                       wfm_ref, bfm_ref, wmt_ref,
                       wm2_ref, bm2_ref, wm3_ref, bm3_ref,
                       out_ref):
    """Whole forward in one invocation; every ref is a full array in VMEM."""
    xcat = xcat_ref[...]      # [B, 2D + id_dim]   = [x0 | x1 | ids]
    x0 = x0_ref[...]          # [B, D]
    x1 = x1_ref[...]          # [B, D]
    t = t_ref[...]            # [T*B, 1]  (t value per step-major row)

    def dot(a, w):
        return jnp.dot(a, w, preferred_element_type=jnp.float32)

    # ---- fused branch MLPs: [x0|x1|ids] -> hidden activations ----
    h = jnp.maximum(dot(xcat, wf1_ref[...]) + bf1_ref[...], 0.0)
    h = jnp.maximum(dot(h, wf2_ref[...]) + bf2_ref[...], 0.0)

    # ---- branch output layer pre-fused with mod_x0_x1 layer 1 (b part) ----
    pre_b = dot(h, wfm_ref[...]) + bfm_ref[...]      # [B, H]

    # ---- replicate to step-major [T*B, ...] rows in-kernel ----
    # (sublane-aligned concatenation of full 8-row tiles: B % 8 == 0)
    pre = jnp.concatenate([pre_b] * T, axis=0)       # [T*B, H]
    x0f = jnp.concatenate([x0] * T, axis=0)          # [T*B, D]
    x1f = jnp.concatenate([x1] * T, axis=0)          # [T*B, D]

    # t row of mod layer-1 is a rank-1 broadcast add
    pre = pre + t * wmt_ref[...]                     # [T*B,1] * [1,H] broadcast
    h = jnp.maximum(pre, 0.0)
    h = jnp.maximum(dot(h, wm2_ref[...]) + bm2_ref[...], 0.0)
    mod_out = dot(h, wm3_ref[...]) + bm3_ref[...]    # [T*B, D]

    # ---- enveloppe + line-initialized curve + combine ----
    env = scale_factor * (1.0 - (t * 2.0 - 1.0) ** k)
    init_curve = (1.0 - t) * x0f + t * x1f
    out_ref[...] = mod_out * env + init_curve


def init_mlp_params(key, in_dim, hidden_dim, out_dim, num_hidden_layers):
    """Weights [in, out] (kaiming-normal-like), biases [1, out] zeros."""
    dims = [in_dim] + [hidden_dim] * num_hidden_layers + [out_dim]
    params = []
    for i in range(len(dims) - 1):
        key, kw = jax.random.split(key)
        w = jax.random.normal(kw, (dims[i], dims[i + 1]), jnp.float32)
        w = w * (2.0 / dims[i]) ** 0.5
        b = jnp.zeros((1, dims[i + 1]), jnp.float32)
        params.append((w, b))
    return params, key


def _block_diag3(a, b, c):
    ra, ca = a.shape
    rb, cb = b.shape
    rc, cc = c.shape
    out = jnp.zeros((ra + rb + rc, ca + cb + cc), jnp.float32)
    out = out.at[:ra, :ca].set(a)
    out = out.at[ra:ra + rb, ca:ca + cb].set(b)
    out = out.at[ra + rb:, ca + cb:].set(c)
    return out


def pack_fused_params(params, hidden_dim, id_emb_dim):
    """Block-diagonally fuse branch MLPs; fold their output layer into mod L1."""
    (w0a, b0a), (w0b, b0b), (w0c, b0c) = params["x0_emb"]
    (w1a, b1a), (w1b, b1b), (w1c, b1c) = params["x1_emb"]
    (wia, bia), (wib, bib) = params["id_net"]
    (wm1, bm1), (wm2, bm2), (wm3, bm3) = params["mod"]
    H, E = hidden_dim, id_emb_dim

    wf1 = _block_diag3(w0a, w1a, wia)                         # [2D+id, 2H+E]
    bf1 = jnp.concatenate([b0a, b1a, bia], axis=1)
    # id branch has only 2 Linears: carry it through layer 2 with identity;
    # its activations are post-ReLU (>= 0) so the fused ReLU is a no-op there.
    wf2 = _block_diag3(w0b, w1b, jnp.eye(E, dtype=jnp.float32))
    bf2 = jnp.concatenate([b0b, b1b, jnp.zeros((1, E), jnp.float32)], axis=1)
    wf3 = _block_diag3(w0c, w1c, wib)                         # [2H+E, 2H+E]
    bf3 = jnp.concatenate([b0c, b1c, bib], axis=1)

    # mod layer-1 weight rows follow torch's concat order
    # [emb_x0 (H), emb_x1 (H), t (1), ids_emb (E)]; pull out the t row.
    wm1_stack = jnp.concatenate([wm1[:H], wm1[H:2 * H], wm1[2 * H + 1:]], axis=0)
    wm_t = wm1[2 * H:2 * H + 1]                               # [1, H]

    # No nonlinearity between the branch output layer and mod layer 1, so
    # fold them into one matmul (done once, host/XLA side).
    wfm = wf3 @ wm1_stack                                     # [2H+E, H]
    bfm = bf3 @ wm1_stack + bm1                               # [1, H]

    return [wf1, bf1, wf2, bf2, wfm, bfm, wm_t, wm2, bm2, wm3, bm3]


def cond_curve_overfit_forward(x0, x1, t, ids, params, *, hidden_dim,
                               id_emb_dim, scale_factor, k=2):
    """x0, x1: [B, D]; t: [T, 1] or [T]; ids: [B, id_dim] -> [T, B, D]."""
    t = t.reshape(-1, 1) if t.ndim == 1 else t
    T = t.shape[0]
    B, D = x0.shape
    assert B % 8 == 0, "B must be a multiple of 8 (sublane-aligned replication)"

    x0 = x0.astype(jnp.float32)
    x1 = x1.astype(jnp.float32)
    ids = ids.astype(jnp.float32)
    # Only O(T*B) scalars are prebuilt; no [T*B, D] tiling in HBM.
    t_full = jnp.repeat(t.astype(jnp.float32), B, axis=0)      # [T*B, 1]
    xcat = jnp.concatenate([x0, x1, ids], axis=1)              # [B, 2D + id_dim]

    fused = pack_fused_params(params, hidden_dim, id_emb_dim)
    kernel = functools.partial(_cond_curve_kernel,
                               int(T), float(scale_factor), int(k))

    # Single invocation (no grid): every operand is a whole-array VMEM block,
    # so there is no pipelining, no per-step index bookkeeping, and no
    # double-buffering of the 11 weight/bias tensors.
    out_flat = pl.pallas_call(
        kernel,
        out_shape=jax.ShapeDtypeStruct((T * B, D), jnp.float32),
    )(xcat, x0, x1, t_full, *fused)

    return out_flat.reshape(T, B, D)


def reference_forward(x0, x1, t, ids, params, *, scale_factor, k=2):
    """Pure-JAX reference mirroring the torch forward (embed_t=False, line)."""
    t = t.reshape(-1, 1) if t.ndim == 1 else t
    T = t.shape[0]
    B, D = x0.shape
    x0_ = jnp.tile(x0, (T, 1))
    x1_ = jnp.tile(x1, (T, 1))
    ids_ = jnp.tile(ids, (T, 1))
    t_ = jnp.repeat(t, B, axis=0)

    def mlp(x, layers):
        for i, (w, b) in enumerate(layers):
            x = x @ w + b
            if i < len(layers) - 1:
                x = jnp.maximum(x, 0.0)
        return x

    emb_x0 = mlp(x0_, params["x0_emb"])
    emb_x1 = mlp(x1_, params["x1_emb"])
    ids_emb = mlp(ids_, params["id_net"])
    init_curve = (1.0 - t_) * x0_ + t_ * x1_
    env = scale_factor * (1.0 - (t_ * 2.0 - 1.0) ** k)
    aug = jnp.concatenate([emb_x0, emb_x1, t_, ids_emb], axis=-1)
    outs = mlp(aug, params["mod"]) * env + init_curve
    return outs.reshape(T, B, D)


if __name__ == "__main__":
    # Small config consistent with the module.
    B, D, H, T = 8, 16, 32, 8          # batch, input_dim, hidden_dim, time steps
    id_dim, id_emb_dim = 8, 16
    num_layers = 2                     # -> 3 Linears per x0_emb / x1_emb / mod MLP
    scale_factor, k = 1.5, 2
    aug_dim = 2 * H + 1 + id_emb_dim   # embed_t=False branch

    key = jax.random.PRNGKey(0)
    key, k0, k1, k2 = jax.random.split(key, 4)
    x0 = jax.random.normal(k0, (B, D), jnp.float32)
    x1 = jax.random.normal(k1, (B, D), jnp.float32)
    ids = jax.random.normal(k2, (B, id_dim), jnp.float32)
    t = jnp.linspace(0.0, 1.0, T, dtype=jnp.float32).reshape(T, 1)

    # Deterministic parameter construction (shapes per module __init__).
    x0_emb_p, key = init_mlp_params(key, D, H, H, num_layers)
    x1_emb_p, key = init_mlp_params(key, D, H, H, num_layers)
    id_p, key = init_mlp_params(key, id_dim, id_emb_dim, id_emb_dim, 1)
    mod_p, key = init_mlp_params(key, aug_dim, H, D, num_layers)

    params = {"x0_emb": x0_emb_p, "x1_emb": x1_emb_p,
              "id_net": id_p, "mod": mod_p}

    out = cond_curve_overfit_forward(
        x0, x1, t, ids, params, hidden_dim=H, id_emb_dim=id_emb_dim,
        scale_factor=scale_factor, k=k)
    out = jax.block_until_ready(out)

    ref = reference_forward(x0, x1, t, ids, params, scale_factor=scale_factor, k=k)
    assert out.shape == (T, B, D)
    # Tolerance slightly widened vs. bit-identical: wf3@wm1 is pre-fused
    # (pure f32 matmul reassociation).
    assert jnp.allclose(out, ref, rtol=1e-4, atol=1e-4), "mismatch vs reference"

    print("KERNEL_OK")
</pallas_src>

<mosaic_0001>
module attributes {stable_mosaic.version = 11 : i64} {
  func.func @_cond_curve_kernel(%arg0: memref<8x40xf32, #tpu.memory_space<vmem>>, %arg1: memref<8x16xf32, #tpu.memory_space<vmem>>, %arg2: memref<8x16xf32, #tpu.memory_space<vmem>>, %arg3: memref<64x1xf32, #tpu.memory_space<vmem>>, %arg4: memref<40x80xf32, #tpu.memory_space<vmem>>, %arg5: memref<1x80xf32, #tpu.memory_space<vmem>>, %arg6: memref<80x80xf32, #tpu.memory_space<vmem>>, %arg7: memref<1x80xf32, #tpu.memory_space<vmem>>, %arg8: memref<80x32xf32, #tpu.memory_space<vmem>>, %arg9: memref<1x32xf32, #tpu.memory_space<vmem>>, %arg10: memref<1x32xf32, #tpu.memory_space<vmem>>, %arg11: memref<32x32xf32, #tpu.memory_space<vmem>>, %arg12: memref<1x32xf32, #tpu.memory_space<vmem>>, %arg13: memref<32x16xf32, #tpu.memory_space<vmem>>, %arg14: memref<1x16xf32, #tpu.memory_space<vmem>>, %arg15: memref<64x16xf32, #tpu.memory_space<vmem>>) attributes {dimension_semantics = [], scalar_prefetch = 0 : i64, scratch_operands = 0 : i64, tpu.core_type = #tpu.core_type<tc>} {
    %c0 = arith.constant 0 : index
    %c0_0 = arith.constant 0 : index
    %0 = vector.load %arg0[%c0, %c0_0] : memref<8x40xf32, #tpu.memory_space<vmem>>, vector<8x40xf32>
    %c0_1 = arith.constant 0 : index
    %c0_2 = arith.constant 0 : index
    %1 = vector.load %arg1[%c0_1, %c0_2] : memref<8x16xf32, #tpu.memory_space<vmem>>, vector<8x16xf32>
    %c0_3 = arith.constant 0 : index
    %c0_4 = arith.constant 0 : index
    %2 = vector.load %arg2[%c0_3, %c0_4] : memref<8x16xf32, #tpu.memory_space<vmem>>, vector<8x16xf32>
    %c0_5 = arith.constant 0 : index
    %c0_6 = arith.constant 0 : index
    %3 = vector.load %arg3[%c0_5, %c0_6] : memref<64x1xf32, #tpu.memory_space<vmem>>, vector<64x1xf32>
    %c0_7 = arith.constant 0 : index
    %c0_8 = arith.constant 0 : index
    %4 = vector.load %arg4[%c0_7, %c0_8] : memref<40x80xf32, #tpu.memory_space<vmem>>, vector<40x80xf32>
    %cst = arith.constant dense<0.000000e+00> : vector<8x80xf32>
    %5 = tpu.matmul %0, %4, %cst {dimension_numbers = #tpu.dot_dimension_numbers<[1], [0], [0], [1], [0, 0, 1, 1], [], []>} : vector<8x40xf32>, vector<40x80xf32>, vector<8x80xf32> -> vector<8x80xf32>
    %c0_9 = arith.constant 0 : index
    %c0_10 = arith.constant 0 : index
    %6 = vector.load %arg5[%c0_9, %c0_10] : memref<1x80xf32, #tpu.memory_space<vmem>>, vector<1x80xf32>
    %7 = vector.broadcast %6 : vector<1x80xf32> to vector<8x80xf32>
    %8 = arith.addf %5, %7 : vector<8x80xf32>
    %cst_11 = arith.constant 0.000000e+00 : f32
    %9 = vector.broadcast %cst_11 : f32 to vector<8x80xf32>
    %10 = arith.maximumf %8, %9 : vector<8x80xf32>
    %c0_12 = arith.constant 0 : index
    %c0_13 = arith.constant 0 : index
    %11 = vector.load %arg6[%c0_12, %c0_13] : memref<80x80xf32, #tpu.memory_space<vmem>>, vector<80x80xf32>
    %cst_14 = arith.constant dense<0.000000e+00> : vector<8x80xf32>
    %12 = tpu.matmul %10, %11, %cst_14 {dimension_numbers = #tpu.dot_dimension_numbers<[1], [0], [0], [1], [0, 0, 1, 1], [], []>} : vector<8x80xf32>, vector<80x80xf32>, vector<8x80xf32> -> vector<8x80xf32>
    %c0_15 = arith.constant 0 : index
    %c0_16 = arith.constant 0 : index
    %13 = vector.load %arg7[%c0_15, %c0_16] : memref<1x80xf32, #tpu.memory_space<vmem>>, vector<1x80xf32>
    %14 = vector.broadcast %13 : vector<1x80xf32> to vector<8x80xf32>
    %15 = arith.addf %12, %14 : vector<8x80xf32>
    %cst_17 = arith.constant 0.000000e+00 : f32
    %16 = vector.broadcast %cst_17 : f32 to vector<8x80xf32>
    %17 = arith.maximumf %15, %16 : vector<8x80xf32>
    %c0_18 = arith.constant 0 : index
    %c0_19 = arith.constant 0 : index
    %18 = vector.load %arg8[%c0_18, %c0_19] : memref<80x32xf32, #tpu.memory_space<vmem>>, vector<80x32xf32>
    %cst_20 = arith.constant dense<0.000000e+00> : vector<8x32xf32>
    %19 = tpu.matmul %17, %18, %cst_20 {dimension_numbers = #tpu.dot_dimension_numbers<[1], [0], [0], [1], [0, 0, 1, 1], [], []>} : vector<8x80xf32>, vector<80x32xf32>, vector<8x32xf32> -> vector<8x32xf32>
    %c0_21 = arith.constant 0 : index
    %c0_22 = arith.constant 0 : index
    %20 = vector.load %arg9[%c0_21, %c0_22] : memref<1x32xf32, #tpu.memory_space<vmem>>, vector<1x32xf32>
    %21 = vector.broadcast %20 : vector<1x32xf32> to vector<8x32xf32>
    %22 = arith.addf %19, %21 : vector<8x32xf32>
    %23 = tpu.concatenate %22, %22, %22, %22, %22, %22, %22, %22 in 0 : vector<8x32xf32>, vector<8x32xf32>, vector<8x32xf32>, vector<8x32xf32>, vector<8x32xf32>, vector<8x32xf32>, vector<8x32xf32>, vector<8x32xf32> -> vector<64x32xf32>
    %24 = tpu.concatenate %1, %1, %1, %1, %1, %1, %1, %1 in 0 : vector<8x16xf32>, vector<8x16xf32>, vector<8x16xf32>, vector<8x16xf32>, vector<8x16xf32>, vector<8x16xf32>, vector<8x16xf32>, vector<8x16xf32> -> vector<64x16xf32>
    %25 = tpu.concatenate %2, %2, %2, %2, %2, %2, %2, %2 in 0 : vector<8x16xf32>, vector<8x16xf32>, vector<8x16xf32>, vector<8x16xf32>, vector<8x16xf32>, vector<8x16xf32>, vector<8x16xf32>, vector<8x16xf32> -> vector<64x16xf32>
    %c0_23 = arith.constant 0 : index
    %c0_24 = arith.constant 0 : index
    %26 = vector.load %arg10[%c0_23, %c0_24] : memref<1x32xf32, #tpu.memory_space<vmem>>, vector<1x32xf32>
    %27 = vector.broadcast %3 : vector<64x1xf32> to vector<64x32xf32>
    %28 = vector.broadcast %26 : vector<1x32xf32> to vector<64x32xf32>
    %29 = arith.mulf %27, %28 : vector<64x32xf32>
    %30 = arith.addf %23, %29 : vector<64x32xf32>
    %cst_25 = arith.constant 0.000000e+00 : f32
    %31 = vector.broadcast %cst_25 : f32 to vector<64x32xf32>
    %32 = arith.maximumf %30, %31 : vector<64x32xf32>
    %c0_26 = arith.constant 0 : index
    %c0_27 = arith.constant 0 : index
    %33 = vector.load %arg11[%c0_26, %c0_27] : memref<32x32xf32, #tpu.memory_space<vmem>>, vector<32x32xf32>
    %cst_28 = arith.constant dense<0.000000e+00> : vector<64x32xf32>
    %34 = tpu.matmul %32, %33, %cst_28 {dimension_numbers = #tpu.dot_dimension_numbers<[1], [0], [0], [1], [0, 0, 1, 1], [], []>} : vector<64x32xf32>, vector<32x32xf32>, vector<64x32xf32> -> vector<64x32xf32>
    %c0_29 = arith.constant 0 : index
    %c0_30 = arith.constant 0 : index
    %35 = vector.load %arg12[%c0_29, %c0_30] : memref<1x32xf32, #tpu.memory_space<vmem>>, vector<1x32xf32>
    %36 = vector.broadcast %35 : vector<1x32xf32> to vector<64x32xf32>
    %37 = arith.addf %34, %36 : vector<64x32xf32>
    %cst_31 = arith.constant 0.000000e+00 : f32
    %38 = vector.broadcast %cst_31 : f32 to vector<64x32xf32>
    %39 = arith.maximumf %37, %38 : vector<64x32xf32>
    %c0_32 = arith.constant 0 : index
    %c0_33 = arith.constant 0 : index
    %40 = vector.load %arg13[%c0_32, %c0_33] : memref<32x16xf32, #tpu.memory_space<vmem>>, vector<32x16xf32>
    %cst_34 = arith.constant dense<0.000000e+00> : vector<64x16xf32>
    %41 = tpu.matmul %39, %40, %cst_34 {dimension_numbers = #tpu.dot_dimension_numbers<[1], [0], [0], [1], [0, 0, 1, 1], [], []>} : vector<64x32xf32>, vector<32x16xf32>, vector<64x16xf32> -> vector<64x16xf32>
    %c0_35 = arith.constant 0 : index
    %c0_36 = arith.constant 0 : index
    %42 = vector.load %arg14[%c0_35, %c0_36] : memref<1x16xf32, #tpu.memory_space<vmem>>, vector<1x16xf32>
    %43 = vector.broadcast %42 : vector<1x16xf32> to vector<64x16xf32>
    %44 = arith.addf %41, %43 : vector<64x16xf32>
    %cst_37 = arith.constant 2.000000e+00 : f32
    %45 = vector.broadcast %cst_37 : f32 to vector<64x1xf32>
    %46 = arith.mulf %3, %45 : vector<64x1xf32>
    %cst_38 = arith.constant 1.000000e+00 : f32
    %47 = vector.broadcast %cst_38 : f32 to vector<64x1xf32>
    %48 = arith.subf %46, %47 : vector<64x1xf32>
    %49 = arith.mulf %48, %48 : vector<64x1xf32>
    %cst_39 = arith.constant 1.000000e+00 : f32
    %50 = vector.broadcast %cst_39 : f32 to vector<64x1xf32>
    %51 = arith.subf %50, %49 : vector<64x1xf32>
    %cst_40 = arith.constant 1.500000e+00 : f32
    %52 = vector.broadcast %cst_40 : f32 to vector<64x1xf32>
    %53 = arith.mulf %52, %51 : vector<64x1xf32>
    %cst_41 = arith.constant 1.000000e+00 : f32
    %54 = vector.broadcast %cst_41 : f32 to vector<64x1xf32>
    %55 = arith.subf %54, %3 : vector<64x1xf32>
    %56 = vector.broadcast %55 : vector<64x1xf32> to vector<64x16xf32>
    %57 = arith.mulf %56, %24 : vector<64x16xf32>
    %58 = vector.broadcast %3 : vector<64x1xf32> to vector<64x16xf32>
    %59 = arith.mulf %58, %25 : vector<64x16xf32>
    %60 = arith.addf %57, %59 : vector<64x16xf32>
    %61 = vector.broadcast %53 : vector<64x1xf32> to vector<64x16xf32>
    %62 = arith.mulf %44, %61 : vector<64x16xf32>
    %63 = arith.addf %62, %60 : vector<64x16xf32>
    %c0_42 = arith.constant 0 : index
    %c0_43 = arith.constant 0 : index
    %64 = vector.load %arg15[%c0_42, %c0_43] : memref<64x16xf32, #tpu.memory_space<vmem>>, vector<64x16xf32>
    tpu.vector_store %arg15[%c0_42, %c0_43], %63 {strides = array<i32>} : memref<64x16xf32, #tpu.memory_space<vmem>>, vector<64x16xf32>,
    return
  }
}

</mosaic_0001>

<bundles_post_ra>
// kernel: tpu_custom_call.1
= control target key start
LH: loop header
LB: loop body
LE: loop exit
PB: predicated region body
PF: predicated region fallthrough
CT: control target
= control target key end

     0   :  { %vm70_vm0 = vcmask 326656   ;;  %v620_v18 = vmov 0   ;;  %vm109_vm1 = vcmask 654336   ;;  %vm247_vm2 = vcmask 261120   ;;  %s988_s4 = inlined_call_operand.vmem [shape: f32[40,80], index: 4, kind: input, shape index: {}]   ;;  %s989_s6 = inlined_call_operand.vmem [shape: f32[80,80], index: 6, kind: input, shape index: {}]   ;;  %s990_s5 = inlined_call_operand.vmem [shape: f32[1,80], index: 5, kind: input, shape index: {}]   ;;  %s991_s0 = inlined_call_operand.vmem [shape: f32[8,40], index: 0, kind: input, shape index: {}]   ;;  %s992_s7 = inlined_call_operand.vmem [shape: f32[1,80], index: 7, kind: input, shape index: {}]   ;;  %s993_s3 = inlined_call_operand.vmem [shape: f32[64,1], index: 3, kind: input, shape index: {}]   ;;  %s994_s8 = inlined_call_operand.vmem [shape: f32[80,32], index: 8, kind: input, shape index: {}]   ;;  %s995_s10 = inlined_call_operand.vmem [shape: f32[1,32], index: 10, kind: input, shape index: {}]   ;;  %s996_s9 = inlined_call_operand.vmem [shape: f32[1,32], index: 9, kind: input, shape index: {}]   ;;  %s997_s12 = inlined_call_operand.vmem [shape: f32[1,32], index: 12, kind: input, shape index: {}]   ;;  %s998_s11 = inlined_call_operand.vmem [shape: f32[32,32], index: 11, kind: input, shape index: {}]   ;;  %s999_s13 = inlined_call_operand.vmem [shape: f32[32,16], index: 13, kind: input, shape index: {}]   ;;  %s1000_s14 = inlined_call_operand.vmem [shape: f32[1,16], index: 14, kind: input, shape index: {}]   ;;  %s1001_s2 = inlined_call_operand.vmem [shape: f32[8,16], index: 2, kind: input, shape index: {}]   ;;  %s1002_s1 = inlined_call_operand.vmem [shape: f32[8,16], index: 1, kind: input, shape index: {}]   ;;  %s1003_s15 = inlined_call_operand.vmem [shape: f32[64,16], index: 15, kind: output, shape index: {}]  }
   0x1   :  { %v65_v0 = vld [vmem:[%s988_s4 + $0x20] sm:$0xff]  ;;  %v64_v1 = vld [vmem:[%s988_s4 + $0x18] sm:$0xff]  ;;  %v63_v2 = vld [vmem:[%s988_s4 + $0x10] sm:$0xff]  ;;  %611 = vset.pattern.permute.xlu0 %v620_v18  ;;  %612 = vset.pattern.permute.xlu1 %v620_v18  ;;  %vm562_vm3 = vcmask 130048  }
   0x2   :  { %85 = vmatpush.msra.mxu2 %v65_v0  ;;  %v104_v3 = vld [vmem:[%s989_s6 + $0x48] sm:$0xff]  ;;  %v103_v4 = vld [vmem:[%s989_s6 + $0x40] sm:$0xff]  ;;  %v102_v6 = vld [vmem:[%s989_s6 + $0x38] sm:$0xff]  ;;  %613 = vset.pattern.permute.xlu2 %v620_v18 }
   0x3   :  { %119 = vmatpush.msra.mxu1 %v104_v3  ;;  %v62_v5 = vld [vmem:[%s988_s4 + $0x8] sm:$0xff]  ;;  %v61_v7 = vld [vmem:[%s988_s4] sm:$0xff]  ;;  %v101_v8 = vld [vmem:[%s989_s6 + $0x30] sm:$0xff] }
   0x4   :  { %86 = vmatpush.msra.mxu2 %v64_v1  ;;  %v50_v9 = vld [vmem:[%s991_s0] sm:$0xff]  ;;  %v100_v10 = vld [vmem:[%s989_s6 + $0x28] sm:$0xff]  ;;  %v98_v12 = vld [vmem:[%s989_s6 + $0x18] sm:$0xff] }
   0x5   :  { %120 = vmatpush.msra.mxu1 %v103_v4  ;;  %v99_v11 = vld [vmem:[%s989_s6 + $0x20] sm:$0xff]  ;;  %v97_v13 = vld [vmem:[%s989_s6 + $0x10] sm:$0xff]  ;;  %v96_v14 = vld [vmem:[%s989_s6 + $0x8] sm:$0xff] }
   0x6   :  { %87 = vmatpush.msra.mxu2 %v63_v2  ;;  %v95_v15 = vld [vmem:[%s989_s6] sm:$0xff]  ;;  %v55_v16 = vld [vmem:[%s993_s3 + $0x10] sm:$0xff]  ;;  %v755_v17 = vld [vmem:[%s993_s3 + $0x18] sm:$0xff] }
   0x7   :  { %121 = vmatpush.msra.mxu1 %v102_v6  ;;  %v143_v19 = vld [vmem:[%s994_s8 + $0x48] sm:$0xff]  ;;  %184 = vperm.xlu0 %611, %v55_v16   ;;  %v142_v20 = vld [vmem:[%s994_s8 + $0x40] sm:$0xff]  ;;  %v141_v21 = vld [vmem:[%s994_s8 + $0x38] sm:$0xff]  ;;  %v436_v32 = vsub.f32 1.0, %v55_v16  ;;  %v396_v38 = vmul.f32 2.0, %v55_v16  ;;  %v397_v44 = vmul.f32 2.0, %v755_v17 }
   0x8   :  { %88 = vmatpush.msra.mxu2 %v62_v5  ;;  %189 = vperm.xlu1 %612, %v755_v17   ;;  %v770_v22 = vld [vmem:[%s993_s3 + $0x20] sm:$0xff]  ;;  %v140_v23 = vld [vmem:[%s994_s8 + $0x30] sm:$0xff]  ;;  %v782_v25 = vld [vmem:[%s993_s3 + $0x8] sm:$0xff]  ;;  %v437_v2 = vsub.f32 1.0, %v755_v17 }
   0x9   :  { %122 = vmatpush.msra.mxu1 %v101_v8  ;;  %194 = vperm.xlu2 %613, %v770_v22   ;;  %v53_v24 = vld [vmem:[%s993_s3] sm:$0xff]  ;;  %v139_v26 = vld [vmem:[%s994_s8 + $0x28] sm:$0xff]  ;;  %v137_v28 = vld [vmem:[%s994_s8 + $0x18] sm:$0xff]  ;;  %v435_v31 = vsub.f32 1.0, %v782_v25  ;;  %v438_v37 = vsub.f32 1.0, %v770_v22  ;;  %v596_v41 = vadd.f32 -1.0, %v396_v38 }
   0xa   :  { %89 = vmatpush.msra.mxu2 %v61_v7  ;;  %v138_v27 = vld [vmem:[%s994_s8 + $0x20] sm:$0xff]  ;;  %v797_v29 = vld [vmem:[%s993_s3 + $0x30] sm:$0xff]  ;;  %v802_v30 = vld [vmem:[%s993_s3 + $0x38] sm:$0xff]  ;;  %v394_v39 = vmul.f32 2.0, %v53_v24  ;;  %v597_v52 = vadd.f32 -1.0, %v397_v44  ;;  %v434_v56 = vsub.f32 1.0, %v53_v24 }
   0xb   :  { %575 = vmatmul.msk.f32.vlgmr.msra.gmra.mxu2 %vm70_vm0, %v50_v9  ;;  %123 = vmatpush.msra.mxu1 %v100_v10  ;;  %v614_v33 = vld [vmem:[%s990_s5] ss:$0 sm:$0xff]  ;;  %v136_v40 = vld [vmem:[%s994_s8 + $0x10] sm:$0xff]  ;;  %v135_v43 = vld [vmem:[%s994_s8 + $0x8] sm:$0xff]  ;;  %v441_v48 = vsub.f32 1.0, %v802_v30  ;;  %v412_v49 = vmul.f32 %v596_v41, %v596_v41  ;;  %v400_v57 = vmul.f32 2.0, %v797_v29 }
   0xc   :  { %157 = vmatpush.msrb.mxu2 %v143_v19  ;;  %v594_v42 = vadd.f32 -1.0, %v394_v39  ;;  %v134_v45 = vld [vmem:[%s994_s8] sm:$0xff]  ;;  %v58_v46 = vld [vmem:[%s993_s3 + $0x28] sm:$0xff]  ;;  %v413_v61 = vmul.f32 %v597_v52, %v597_v52  ;;  %v395_v1 = vmul.f32 2.0, %v782_v25  ;;  %v440_v8 = vsub.f32 1.0, %v797_v29 }
   0xd   :  { %124 = vmatpush.msra.mxu1 %v99_v11  ;;  %v439_v47 = vsub.f32 1.0, %v58_v46  ;;  %v399_v51 = vmul.f32 2.0, %v58_v46  ;;  %v420_v53 = vsub.f32 1.0, %v412_v49  ;;  %v600_v62 = vadd.f32 -1.0, %v400_v57 }
   0xe   :  { %158 = vmatpush.msrb.mxu2 %v142_v20  ;;  %v410_v50 = vmul.f32 %v594_v42, %v594_v42  ;;  %v421_v0 = vsub.f32 1.0, %v413_v61  ;;  %v595_v6 = vadd.f32 -1.0, %v395_v1  ;;  %v398_v10 = vmul.f32 2.0, %v770_v22 }
   0xf   :  { %125 = vmatpush.msra.mxu1 %v98_v12  ;;  %174 = vperm.xlu0 %611, %v53_v24   ;;  %v599_v55 = vadd.f32 -1.0, %v399_v51  ;;  %v428_v58 = vmul.f32 1.5, %v420_v53  ;;  %v416_v5 = vmul.f32 %v600_v62, %v600_v62  ;;  %v324_v53 = vld [vmem:[%s999_s13 + $0x18] sm:$0xff] }
  0x10   :  { %159 = vmatpush.msrb.mxu2 %v141_v21  ;;  %179 = vperm.xlu1 %612, %v782_v25   ;;  %v418_v54 = vsub.f32 1.0, %v410_v50  ;;  %v429_v4 = vmul.f32 1.5, %v421_v0  ;;  %v411_v9 = vmul.f32 %v595_v6, %v595_v6  ;;  %v321_v6 = vld [vmem:[%s999_s13] sm:$0xff] }
  0x11   :  { %126 = vmatpush.msra.mxu1 %v97_v13  ;;  %199 = vperm.xlu2 %613, %v58_v46   ;;  %v415_v60 = vmul.f32 %v599_v55, %v599_v55  ;;  %v424_v7 = vsub.f32 1.0, %v416_v5  ;;  %v598_v13 = vadd.f32 -1.0, %v398_v10  ;;  %v322_v5 = vld [vmem:[%s999_s13 + $0x8] sm:$0xff] }
  0x12   :  { %160 = vmatpush.msrb.mxu2 %v140_v23  ;;  %v426_v59 = vmul.f32 1.5, %v418_v54  ;;  %v419_v12 = vsub.f32 1.0, %v411_v9  ;;  %365 = vmatpush.msra.mxu0 %v324_v53 }
  0x13   :  { %127 = vmatpush.msra.mxu1 %v96_v14  ;;  %v423_v63 = vsub.f32 1.0, %v415_v60  ;;  %v432_v11 = vmul.f32 1.5, %v424_v7  ;;  %v615_v14 = vld [vmem:[%s992_s7] ss:$0 sm:$0xff]  ;;  %v414_v18 = vmul.f32 %v598_v13, %v598_v13 }
  0x14   :  { %161 = vmatpush.msrb.mxu2 %v139_v26  ;;  %v427_v17 = vmul.f32 1.5, %v419_v12  ;;  %v618_v7 = vld [vmem:[%s997_s12] ss:$0 sm:$0xff] }
  0x15   :  { %128 = vmatpush.msra.mxu1 %v95_v15  ;;  %v431_v3 = vmul.f32 1.5, %v423_v63  ;;  %v401_v15 = vmul.f32 2.0, %v802_v30  ;;  %v422_v23 = vsub.f32 1.0, %v414_v18 }
  0x16   :  { %162 = vmatpush.msrb.mxu2 %v138_v27  ;;  %v242_v27 = vld [vmem:[%s998_s11 + $0x18] sm:$0xff] }
  0x17   :  { %204 = vperm.xlu0 %611, %v797_v29   ;;  %v601_v21 = vadd.f32 -1.0, %v401_v15  ;;  %v430_v22 = vmul.f32 1.5, %v422_v23  ;;  %602 = vmatpush.msra.mxu3 %v242_v27  ;;  %v240_v29 = vld [vmem:[%s998_s11 + $0x8] sm:$0xff] }
  0x18   :  { %163 = vmatpush.msrb.mxu2 %v137_v28  ;;  %209 = vperm.xlu1 %612, %v802_v30   ;;  %v241_v28 = vld [vmem:[%s998_s11 + $0x10] sm:$0xff]  ;;  %v239_v30 = vld [vmem:[%s998_s11] sm:$0xff] }
  0x19   :  { %444 = vperm.xlu2 %613, %v434_v56   ;;  %v417_v24 = vmul.f32 %v601_v21, %v601_v21  ;;  %603 = vmatpush.msra.mxu3 %v241_v28 }
  0x1a   :  { %164 = vmatpush.msrb.mxu2 %v136_v40  ;;  %606 = vmatpush.msrb.mxu1 %v324_v53 }
  0x1b   :  { %v425_v25 = vsub.f32 1.0, %v417_v24  ;;  %604 = vmatpush.msra.mxu3 %v240_v29 }
  0x1c   :  { %165 = vmatpush.msrb.mxu2 %v135_v43 }
  0x1d   :  { %v433_v26 = vmul.f32 1.5, %v425_v25  ;;  %605 = vmatpush.msra.mxu3 %v239_v30 }
  0x1e   :  { %166 = vmatpush.msrb.mxu2 %v134_v45 }
  0x1f   :  { %449 = vperm.xlu0 %611, %v435_v31  }
  0x20   :  { %454 = vperm.xlu1 %612, %v436_v32   ;;  %284 = vmatpush.msra.mxu2 %v242_v27 }
  0x21   :  { %459 = vperm.xlu2 %613, %v437_v2  }
  0x22   :  { %285 = vmatpush.msra.mxu2 %v241_v28 }
  0x24   :  { %286 = vmatpush.msra.mxu2 %v240_v29 }
  0x26   :  { %287 = vmatpush.msra.mxu2 %v239_v30 }
  0x27   :  { %464 = vperm.xlu0 %611, %v438_v37  }
  0x28   :  { %469 = vperm.xlu1 %612, %v439_v47  }
  0x29   :  { %474 = vperm.xlu2 %613, %v440_v8  }
  0x2f   :  { %479 = vperm.xlu0 %611, %v441_v48  }
  0x30   :  { %508 = vperm.xlu1 %612, %v426_v59  }
  0x31   :  { %513 = vperm.xlu2 %613, %v427_v17  }
  0x37   :  { %518 = vperm.xlu0 %611, %v428_v58  }
  0x38   :  { %523 = vperm.xlu1 %612, %v429_v4   ;;  %v323_v4 = vld [vmem:[%s999_s13 + $0x10] sm:$0xff] }
  0x39   :  { %528 = vperm.xlu2 %613, %v430_v22   ;;  %366 = vmatpush.msra.mxu0 %v323_v4 }
  0x3a   :  { %607 = vmatpush.msrb.mxu1 %v323_v4 }
  0x3b   :  { %367 = vmatpush.msra.mxu0 %v322_v5 }
  0x3c   :  { %608 = vmatpush.msrb.mxu1 %v322_v5 }
  0x3d   :  { %368 = vmatpush.msra.mxu0 %v321_v6 }
  0x3e   :  { %609 = vmatpush.msrb.mxu1 %v321_v6 }
  0x3f   :  { %533 = vperm.xlu0 %611, %v431_v3  }
  0x40   :  { %538 = vperm.xlu1 %612, %v432_v11  }
  0x41   :  { %543 = vperm.xlu2 %613, %v433_v26  }
  0x63   :  { %v868_v49 = vpop.permute.xlu2 %194 }
  0x6b   :  { %v876_v55 = vpop.permute.xlu2 %199 }
  0x79   :  { %v848_v31 = vpop.permute.xlu0 %184 }
  0x7a   :  { %v850_v32 = vpop.permute.xlu1 %189 }
  0x82   :  { %v862_v42 = vpop.permute.xlu1 %179 }
  0x8a   :  { %v884_v63 = vpop.permute.xlu1 %209 }
  0x8e   :  { %v91_v34 = vpop.f32.mrf.mxu2 }
  0x8f   :  { %v92_v35 = vadd.f32 %v614_v33, %v91_v34  ;;  %v616_v33 = vld [vmem:[%s995_s10] ss:$0 sm:$0xff] }
  0x90   :  { %v617_v34 = vld [vmem:[%s996_s9] ss:$0 sm:$0xff]  ;;  %v218_v43 = vmul.f32 %v616_v33, %v850_v32  ;;  %v216_v44 = vmul.f32 %v616_v33, %v862_v42  ;;  %v219_v50 = vmul.f32 %v616_v33, %v868_v49  ;;  %v220_v56 = vmul.f32 %v616_v33, %v876_v55 }
  0x91   :  { %v94_v36 = vmax.f32 %v92_v35, 0.0  ;;  %v858_v35 = vpop.permute.xlu0 %174  ;;  %v222_v0 = vmul.f32 %v616_v33, %v884_v63 }
  0x92   :  { %v215_v37 = vmul.f32 %v616_v33, %v858_v35 }
  0x93   :  { %576 = vmatmul.msk.f32.vlgmr.msra.gmra.mxu1 %vm109_vm1, %v94_v36  ;;  %v217_v36 = vmul.f32 %v616_v33, %v848_v31 }
  0x99   :  { %v880_v59 = vpop.permute.xlu0 %204 }
  0x9a   :  { %v221_v60 = vmul.f32 %v616_v33, %v880_v59 }
 0x110   :  { %v130_v16 = vpop.f32.mrf.mxu1 }
 0x111   :  { %v131_v19 = vadd.f32 %v615_v14, %v130_v16 }
 0x113   :  { %v133_v20 = vmax.f32 %v131_v19, 0.0 }
 0x115   :  { %577 = vmatmul.msk.f32.vlgmr.msrb.gmra.mxu2 %vm109_vm1, %v133_v20 }
 0x198   :  { %v168_v38 = vpop.f32.mrf.mxu2 }
 0x199   :  { %v169_v39 = vadd.f32 %v617_v34, %v168_v38  ;;  %v445_v34 = vpop.permute.xlu2 %444 }
 0x19b   :  { %v223_v40 = vadd.f32 %v215_v37, %v169_v39  ;;  %v225_v41 = vadd.f32 %v217_v36, %v169_v39  ;;  %v224_v47 = vadd.f32 %v216_v44, %v169_v39  ;;  %v226_v48 = vadd.f32 %v218_v43, %v169_v39  ;;  %v455_v36 = vpop.permute.xlu1 %454  ;;  %v450_v37 = vpop.permute.xlu0 %449  ;;  %v922_v44 = vld [vmem:[%s1000_s14] ss:$0 sm:$0xff] }
 0x19c   :  { %v227_v54 = vadd.f32 %v219_v50, %v169_v39  ;;  %v228_v58 = vadd.f32 %v220_v56, %v169_v39  ;;  %v229_v62 = vadd.f32 %v221_v60, %v169_v39  ;;  %v230_v2 = vadd.f32 %v222_v0, %v169_v39 }
 0x19d   :  { %v231_v45 = vmax.f32 %v223_v40, 0.0  ;;  %v233_v46 = vmax.f32 %v225_v41, 0.0  ;;  %v232_v51 = vmax.f32 %v224_v47, 0.0  ;;  %v234_v52 = vmax.f32 %v226_v48, 0.0  ;;  %v912_v40 = vld [vmem:[%s1001_s2] sm:$0xff] }
 0x19e   :  { %v235_v57 = vmax.f32 %v227_v54, 0.0  ;;  %v236_v61 = vmax.f32 %v228_v58, 0.0  ;;  %v237_v1 = vmax.f32 %v229_v62, 0.0  ;;  %v238_v3 = vmax.f32 %v230_v2, 0.0  ;;  %v917_v41 = vld [vmem:[%s1002_s1] sm:$0xff] }
 0x19f   :  { %578 = vmatmul.msk.f32.vlgmr.msra.gmra.mxu2 %vm247_vm2, %v231_v45  ;;  %580 = vmatmul.msk.f32.vlgmr.msra.gmra.mxu3 %vm247_vm2, %v233_v46  ;;  %v490_v45 = vmul.f32 %v858_v35, %v912_v40  ;;  %v482_v46 = vmul.f32 %v445_v34, %v917_v41  ;;  %v483_v58 = vmul.f32 %v450_v37, %v917_v41 }
 0x1a0   :  { %v492_v2 = vmul.f32 %v848_v31, %v912_v40  ;;  %v495_v31 = vmul.f32 %v876_v55, %v912_v40 }
 0x1a1   :  { %v460_v38 = vpop.permute.xlu2 %459 }
 0x1a3   :  { %v470_v39 = vpop.permute.xlu1 %469  ;;  %v465_v43 = vpop.permute.xlu0 %464 }
 0x1a7   :  { %579 = vmatmul.msk.f32.gmra.mxu2 %vm247_vm2, %v232_v51  ;;  %581 = vmatmul.msk.f32.gmra.mxu3 %vm247_vm2, %v234_v52  ;;  %v498_v52 = vadd.f32 %v490_v45, %v482_v46 }
 0x1a9   :  { %v475_v47 = vpop.permute.xlu2 %474 }
 0x1ab   :  { %v509_v51 = vpop.permute.xlu1 %508  ;;  %v480_v56 = vpop.permute.xlu0 %479 }
 0x1af   :  { %582 = vmatmul.msk.f32.gmra.mxu3 %vm247_vm2, %v235_v57  ;;  %v491_v57 = vmul.f32 %v862_v42, %v912_v40 }
 0x1b1   :  { %v499_v62 = vadd.f32 %v491_v57, %v483_v58 }
 0x1b3   :  { %v519_v42 = vpop.permute.xlu0 %518 }
 0x1b7   :  { %583 = vmatmul.msk.f32.gmra.mxu3 %vm247_vm2, %v236_v61  ;;  %v514_v61 = vpop.permute.xlu2 %513 }
 0x1bf   :  { %584 = vmatmul.msk.f32.gmra.mxu3 %vm247_vm2, %v237_v1 }
 0x1c7   :  { %585 = vmatmul.msk.f32.gmra.mxu3 %vm247_vm2, %v238_v3  ;;  %v484_v3 = vmul.f32 %v455_v36, %v917_v41 }
 0x1c9   :  { %v500_v6 = vadd.f32 %v492_v2, %v484_v3 }
 0x222   :  { %v289_v8 = vpop.f32.mrf.mxu2  ;;  %v295_v9 = vpop.f32.mrf.mxu3 }
 0x223   :  { %v290_v10 = vadd.f32 %v618_v7, %v289_v8  ;;  %v296_v16 = vadd.f32 %v618_v7, %v295_v9  ;;  %v493_v9 = vmul.f32 %v850_v32, %v912_v40  ;;  %v534_v32 = vpop.permute.xlu0 %533 }
 0x225   :  { %v313_v11 = vmax.f32 %v290_v10, 0.0  ;;  %v315_v18 = vmax.f32 %v296_v16, 0.0  ;;  %v487_v10 = vmul.f32 %v470_v39, %v917_v41  ;;  %v497_v39 = vmul.f32 %v884_v63, %v912_v40 }
 0x227   :  { %586 = vmatmul.msk.f32.vlgmr.msra.gmra.mxu0 %vm247_vm2, %v313_v11  ;;  %v485_v11 = vmul.f32 %v460_v38, %v917_v41 }
 0x22a   :  { %v292_v12 = vpop.f32.mrf.mxu2  ;;  %v298_v13 = vpop.f32.mrf.mxu3 }
 0x22b   :  { %v293_v14 = vadd.f32 %v618_v7, %v292_v12  ;;  %v299_v19 = vadd.f32 %v618_v7, %v298_v13  ;;  %v524_v12 = vpop.permute.xlu1 %523 }
 0x22d   :  { %v314_v15 = vmax.f32 %v293_v14, 0.0  ;;  %v316_v23 = vmax.f32 %v299_v19, 0.0 }
 0x22f   :  { %587 = vmatmul.msk.f32.gmra.mxu0 %vm247_vm2, %v314_v15 }
 0x232   :  { %v301_v17 = vpop.f32.mrf.mxu3 }
 0x233   :  { %v302_v24 = vadd.f32 %v618_v7, %v301_v17  ;;  %v503_v17 = vadd.f32 %v495_v31, %v487_v10 }
 0x235   :  { %v317_v27 = vmax.f32 %v302_v24, 0.0  ;;  %v486_v24 = vmul.f32 %v465_v43, %v917_v41  ;;  %v489_v43 = vmul.f32 %v480_v56, %v917_v41 }
 0x237   :  { %588 = vmatmul.msk.f32.gmra.mxu0 %vm247_vm2, %v315_v18  ;;  %v501_v18 = vadd.f32 %v493_v9, %v485_v11 }
 0x23a   :  { %v304_v20 = vpop.f32.mrf.mxu3 }
 0x23b   :  { %v305_v21 = vadd.f32 %v618_v7, %v304_v20 }
 0x23d   :  { %v318_v22 = vmax.f32 %v305_v21, 0.0 }
 0x23f   :  { %589 = vmatmul.msk.f32.gmra.mxu0 %vm247_vm2, %v316_v23  ;;  %591 = vmatmul.msk.f32.vlgmr.msrb.gmra.mxu1 %vm247_vm2, %v318_v22  ;;  %v494_v23 = vmul.f32 %v868_v49, %v912_v40  ;;  %v496_v22 = vmul.f32 %v880_v59, %v912_v40 }
 0x242   :  { %v307_v25 = vpop.f32.mrf.mxu3 }
 0x243   :  { %v308_v26 = vadd.f32 %v618_v7, %v307_v25  ;;  %v488_v25 = vmul.f32 %v475_v47, %v917_v41 }
 0x245   :  { %v319_v28 = vmax.f32 %v308_v26, 0.0  ;;  %v529_v26 = vpop.permute.xlu2 %528 }
 0x247   :  { %590 = vmatmul.msk.f32.gmra.mxu0 %vm247_vm2, %v317_v27  ;;  %592 = vmatmul.msk.f32.gmra.mxu1 %vm247_vm2, %v319_v28 }
 0x24a   :  { %v310_v29 = vpop.f32.mrf.mxu3 }
 0x24b   :  { %v311_v30 = vadd.f32 %v618_v7, %v310_v29  ;;  %v539_v29 = vpop.permute.xlu1 %538 }
 0x24d   :  { %v320_v33 = vmax.f32 %v311_v30, 0.0  ;;  %v502_v30 = vadd.f32 %v494_v23, %v486_v24  ;;  %v544_v47 = vpop.permute.xlu2 %543 }
 0x24f   :  { %593 = vmatmul.msk.f32.gmra.mxu1 %vm247_vm2, %v320_v33  ;;  %v504_v33 = vadd.f32 %v496_v22, %v488_v25 }
 0x2a4   :  { %v370_v48 = vpop.f32.mrf.mxu0 }
 0x2a5   :  { %v371_v50 = vadd.f32 %v922_v44, %v370_v48  ;;  %v505_v48 = vadd.f32 %v497_v39, %v489_v43 }
 0x2a7   :  { %v546_v53 = vmul.f32 %v509_v51, %v371_v50 }
 0x2a9   :  { %v554_v54 = vadd.f32 %v546_v53, %v498_v52 }
 0x2ab   :  { %563 = vst.msk [vmem:[%s1003_s15] sm:$0xff] %vm562_vm3, %v554_v54 }
 0x2ac   :  { %v373_v35 = vpop.f32.mrf.mxu0 }
 0x2ad   :  { %v374_v60 = vadd.f32 %v922_v44, %v373_v35 }
 0x2af   :  { %v547_v0 = vmul.f32 %v514_v61, %v374_v60 }
 0x2b1   :  { %v555_v1 = vadd.f32 %v547_v0, %v499_v62 }
 0x2b3   :  { %564 = vst.msk [vmem:[%s1003_s15 + $0x8] sm:$0xff] %vm562_vm3, %v555_v1 }
 0x2b4   :  { %v376_v4 = vpop.f32.mrf.mxu0 }
 0x2b5   :  { %v377_v5 = vadd.f32 %v922_v44, %v376_v4 }
 0x2b7   :  { %v548_v7 = vmul.f32 %v519_v42, %v377_v5 }
 0x2b9   :  { %v556_v8 = vadd.f32 %v548_v7, %v500_v6 }
 0x2bb   :  { %565 = vst.msk [vmem:[%s1003_s15 + $0x10] sm:$0xff] %vm562_vm3, %v556_v8 }
 0x2bc   :  { %v379_v13 = vpop.f32.mrf.mxu0  ;;  %v385_v14 = vpop.f32.mrf.mxu1 }
 0x2bd   :  { %v380_v15 = vadd.f32 %v922_v44, %v379_v13  ;;  %v386_v16 = vadd.f32 %v922_v44, %v385_v14 }
 0x2bf   :  { %v549_v55 = vmul.f32 %v524_v12, %v380_v15  ;;  %v551_v19 = vmul.f32 %v534_v32, %v386_v16 }
 0x2c1   :  { %v557_v20 = vadd.f32 %v549_v55, %v501_v18  ;;  %v559_v21 = vadd.f32 %v551_v19, %v503_v17 }
 0x2c3   :  { %566 = vst.msk [vmem:[%s1003_s15 + $0x18] sm:$0xff] %vm562_vm3, %v557_v20 }
 0x2c4   :  { %568 = vst.msk [vmem:[%s1003_s15 + $0x28] sm:$0xff] %vm562_vm3, %v559_v21  ;;  %v382_v27 = vpop.f32.mrf.mxu0  ;;  %v388_v49 = vpop.f32.mrf.mxu1 }
 0x2c5   :  { %v383_v28 = vadd.f32 %v922_v44, %v382_v27  ;;  %v389_v59 = vadd.f32 %v922_v44, %v388_v49 }
 0x2c7   :  { %v550_v34 = vmul.f32 %v529_v26, %v383_v28  ;;  %v552_v36 = vmul.f32 %v539_v29, %v389_v59 }
 0x2c9   :  { %v558_v37 = vadd.f32 %v550_v34, %v502_v30  ;;  %v560_v38 = vadd.f32 %v552_v36, %v504_v33 }
 0x2cb   :  { %567 = vst.msk [vmem:[%s1003_s15 + $0x20] sm:$0xff] %vm562_vm3, %v558_v37 }
 0x2cc   :  { %569 = vst.msk [vmem:[%s1003_s15 + $0x30] sm:$0xff] %vm562_vm3, %v560_v38  ;;  %v391_v45 = vpop.f32.mrf.mxu1 }
 0x2cd   :  { %v392_v46 = vadd.f32 %v922_v44, %v391_v45 }
 0x2cf   :  { %v553_v50 = vmul.f32 %v544_v47, %v392_v46 }
 0x2d1   :  { %v561_v51 = vadd.f32 %v553_v50, %v505_v48 }
 0x2d3   :  { %570 = vst.msk [vmem:[%s1003_s15 + $0x38] sm:$0xff] %vm562_vm3, %v561_v51 }

</bundles_post_ra>
